<compile_context>
chip_gen: v6e
topology: v6e:2x2x1
jax: 0.10.0
libtpu: 0.0.40
codegen_flags: <defaults>
</compile_context>

<pallas_src>
import jax
import jax.numpy as jnp
from jax.experimental import pallas as pl
from jax.experimental.pallas import tpu as pltpu

SUBLANE = 8
LANE = 128


def _round_up(x, m):
    return ((x + m - 1) // m) * m


def dqn_kernel(x_ref, w1_ref, b1_ref, w2_ref, b2_ref, w3_ref, b3_ref, o_ref):
    # One batch tile per grid step; weights are VMEM-resident across the grid.
    x = x_ref[...]
    h1 = jnp.dot(x, w1_ref[...], preferred_element_type=jnp.float32) + b1_ref[...]
    h1 = jnp.maximum(h1, 0.0)
    h2 = jnp.dot(h1, w2_ref[...], preferred_element_type=jnp.float32) + b2_ref[...]
    h2 = jnp.maximum(h2, 0.0)
    out = jnp.dot(h2, w3_ref[...], preferred_element_type=jnp.float32) + b3_ref[...]
    o_ref[...] = out.astype(o_ref.dtype)


def dqn_forward(x, params, *, block_batch=256):
    """Forward pass. x: (batch, n_observations) f32. Returns (batch, n_actions) f32."""
    w1, b1, w2, b2, w3, b3 = params
    batch, n_obs = x.shape
    hidden = w1.shape[1]
    n_actions = w3.shape[1]

    # --- Pad K (n_observations) up to the sublane boundary (zero rows of w1
    #     contribute nothing, so results are unchanged). ---
    k_pad = max(_round_up(n_obs, SUBLANE), SUBLANE)
    if k_pad != n_obs:
        x = jnp.pad(x, ((0, 0), (0, k_pad - n_obs)))
        w1 = jnp.pad(w1, ((0, k_pad - n_obs), (0, 0)))

    # --- Pad the final layer to a lane-dense output width (multiple of 128).
    #     Extra columns have zero weight and zero bias; sliced off below. ---
    n_pad = max(_round_up(n_actions, LANE), LANE)
    if n_pad != n_actions:
        w3 = jnp.pad(w3, ((0, 0), (0, n_pad - n_actions)))
        b3 = jnp.pad(b3, ((0, 0), (0, n_pad - n_actions)))

    # --- Choose a batch tile. Small batches: one grid step (no extra overhead).
    #     Large batches: grid over batch with x/out pipelined, weights resident. ---
    if batch >= block_batch:
        tb = block_batch
    else:
        tb = max(_round_up(batch, SUBLANE), SUBLANE)
    m_pad = _round_up(batch, tb)
    if m_pad != batch:
        x = jnp.pad(x, ((0, m_pad - batch), (0, 0)))
    grid = (m_pad // tb,)

    resident = lambda shape: pl.BlockSpec(shape, lambda i: (0, 0))

    out_padded = pl.pallas_call(
        dqn_kernel,
        out_shape=jax.ShapeDtypeStruct((m_pad, n_pad), jnp.float32),
        grid=grid,
        in_specs=[
            pl.BlockSpec((tb, k_pad), lambda i: (i, 0)),   # x: tiled over batch
            resident((k_pad, hidden)),                      # w1
            resident((1, hidden)),                          # b1
            resident((hidden, hidden)),                     # w2
            resident((1, hidden)),                          # b2
            resident((hidden, n_pad)),                      # w3 (lane-dense)
            resident((1, n_pad)),                           # b3 (lane-dense)
        ],
        out_specs=pl.BlockSpec((tb, n_pad), lambda i: (i, 0)),
        compiler_params=pltpu.CompilerParams(
            dimension_semantics=("parallel",),  # 2-TC sharding on v7x; no-op elsewhere
        ),
    )(x, w1, b1, w2, b2, w3, b3)

    return out_padded[:batch, :n_actions]


def init_dqn_params(key, n_observations, n_actions, hidden=128):
    """Deterministic init mimicking nn.Linear default (uniform +-1/sqrt(fan_in))."""
    ks = jax.random.split(key, 6)

    def linear(kw, kb, fan_in, fan_out):
        bound = 1.0 / jnp.sqrt(jnp.float32(fan_in))
        w = jax.random.uniform(kw, (fan_in, fan_out), jnp.float32, -bound, bound)
        b = jax.random.uniform(kb, (1, fan_out), jnp.float32, -bound, bound)
        return w, b

    w1, b1 = linear(ks[0], ks[1], n_observations, hidden)
    w2, b2 = linear(ks[2], ks[3], hidden, hidden)
    w3, b3 = linear(ks[4], ks[5], hidden, n_actions)
    return (w1, b1, w2, b2, w3, b3)


def dqn_reference(x, params):
    w1, b1, w2, b2, w3, b3 = params
    h1 = jnp.maximum(x @ w1 + b1, 0.0)
    h2 = jnp.maximum(h1 @ w2 + b2, 0.0)
    return h2 @ w3 + b3


if __name__ == "__main__":
    # Small CartPole-like sizes: n_observations=4, n_actions=2.
    batch, n_observations, n_actions = 8, 4, 2

    key = jax.random.PRNGKey(0)
    kx, kp, kx_big = jax.random.split(key, 3)
    x = jax.random.normal(kx, (batch, n_observations), jnp.float32)
    params = init_dqn_params(kp, n_observations, n_actions)

    # Small-batch path (single grid step).
    out = jax.block_until_ready(dqn_forward(x, params))
    ref = dqn_reference(x, params)
    assert out.shape == (batch, n_actions)
    assert jnp.allclose(out, ref, atol=1e-5, rtol=1e-5), "mismatch vs reference (small batch)"

    # Large-batch path (batch grid, pipelined x/out, resident weights).
    big_batch = 512
    xb = jax.random.normal(kx_big, (big_batch, n_observations), jnp.float32)
    out_b = jax.block_until_ready(dqn_forward(xb, params, block_batch=256))
    ref_b = dqn_reference(xb, params)
    assert out_b.shape == (big_batch, n_actions)
    assert jnp.allclose(out_b, ref_b, atol=1e-4, rtol=1e-4), "mismatch vs reference (big batch)"

    print("KERNEL_OK")
</pallas_src>

<mosaic_0001>
module attributes {stable_mosaic.version = 11 : i64} {
  func.func @dqn_kernel(%arg0: i32, %arg1: memref<8x8xf32, #tpu.memory_space<vmem>>, %arg2: memref<8x128xf32, #tpu.memory_space<vmem>>, %arg3: memref<1x128xf32, #tpu.memory_space<vmem>>, %arg4: memref<128x128xf32, #tpu.memory_space<vmem>>, %arg5: memref<1x128xf32, #tpu.memory_space<vmem>>, %arg6: memref<128x128xf32, #tpu.memory_space<vmem>>, %arg7: memref<1x128xf32, #tpu.memory_space<vmem>>, %arg8: memref<8x128xf32, #tpu.memory_space<vmem>>) attributes {dimension_semantics = [#tpu.dimension_semantics<parallel>], iteration_bounds = array<i64: 1>, scalar_prefetch = 0 : i64, scratch_operands = 0 : i64, tpu.core_type = #tpu.core_type<tc>, window_params = [{transform_indices = @transform_0, window_bounds = array<i64: 8, 8>}, {pipeline_mode = #tpu.pipeline_mode<synchronous>, transform_indices = @transform_1, window_bounds = array<i64: 8, 128>}, {pipeline_mode = #tpu.pipeline_mode<synchronous>, transform_indices = @transform_2, window_bounds = array<i64: 1, 128>}, {pipeline_mode = #tpu.pipeline_mode<synchronous>, transform_indices = @transform_3, window_bounds = array<i64: 128, 128>}, {pipeline_mode = #tpu.pipeline_mode<synchronous>, transform_indices = @transform_4, window_bounds = array<i64: 1, 128>}, {pipeline_mode = #tpu.pipeline_mode<synchronous>, transform_indices = @transform_5, window_bounds = array<i64: 128, 128>}, {pipeline_mode = #tpu.pipeline_mode<synchronous>, transform_indices = @transform_6, window_bounds = array<i64: 1, 128>}, {transform_indices = @transform_7, window_bounds = array<i64: 8, 128>}]} {
    %c0 = arith.constant 0 : index
    %c0_0 = arith.constant 0 : index
    %0 = vector.load %arg1[%c0, %c0_0] : memref<8x8xf32, #tpu.memory_space<vmem>>, vector<8x8xf32>
    %c0_1 = arith.constant 0 : index
    %c0_2 = arith.constant 0 : index
    %1 = vector.load %arg2[%c0_1, %c0_2] : memref<8x128xf32, #tpu.memory_space<vmem>>, vector<8x128xf32>
    %cst = arith.constant dense<0.000000e+00> : vector<8x128xf32>
    %2 = tpu.matmul %0, %1, %cst {dimension_numbers = #tpu.dot_dimension_numbers<[1], [0], [0], [1], [0, 0, 1, 1], [], []>} : vector<8x8xf32>, vector<8x128xf32>, vector<8x128xf32> -> vector<8x128xf32>
    %c0_3 = arith.constant 0 : index
    %c0_4 = arith.constant 0 : index
    %3 = vector.load %arg3[%c0_3, %c0_4] : memref<1x128xf32, #tpu.memory_space<vmem>>, vector<1x128xf32>
    %4 = vector.broadcast %3 : vector<1x128xf32> to vector<8x128xf32>
    %5 = arith.addf %2, %4 : vector<8x128xf32>
    %cst_5 = arith.constant 0.000000e+00 : f32
    %6 = vector.broadcast %cst_5 : f32 to vector<8x128xf32>
    %7 = arith.maximumf %5, %6 : vector<8x128xf32>
    %c0_6 = arith.constant 0 : index
    %c0_7 = arith.constant 0 : index
    %8 = vector.load %arg4[%c0_6, %c0_7] : memref<128x128xf32, #tpu.memory_space<vmem>>, vector<128x128xf32>
    %cst_8 = arith.constant dense<0.000000e+00> : vector<8x128xf32>
    %9 = tpu.matmul %7, %8, %cst_8 {dimension_numbers = #tpu.dot_dimension_numbers<[1], [0], [0], [1], [0, 0, 1, 1], [], []>} : vector<8x128xf32>, vector<128x128xf32>, vector<8x128xf32> -> vector<8x128xf32>
    %c0_9 = arith.constant 0 : index
    %c0_10 = arith.constant 0 : index
    %10 = vector.load %arg5[%c0_9, %c0_10] : memref<1x128xf32, #tpu.memory_space<vmem>>, vector<1x128xf32>
    %11 = vector.broadcast %10 : vector<1x128xf32> to vector<8x128xf32>
    %12 = arith.addf %9, %11 : vector<8x128xf32>
    %cst_11 = arith.constant 0.000000e+00 : f32
    %13 = vector.broadcast %cst_11 : f32 to vector<8x128xf32>
    %14 = arith.maximumf %12, %13 : vector<8x128xf32>
    %c0_12 = arith.constant 0 : index
    %c0_13 = arith.constant 0 : index
    %15 = vector.load %arg6[%c0_12, %c0_13] : memref<128x128xf32, #tpu.memory_space<vmem>>, vector<128x128xf32>
    %cst_14 = arith.constant dense<0.000000e+00> : vector<8x128xf32>
    %16 = tpu.matmul %14, %15, %cst_14 {dimension_numbers = #tpu.dot_dimension_numbers<[1], [0], [0], [1], [0, 0, 1, 1], [], []>} : vector<8x128xf32>, vector<128x128xf32>, vector<8x128xf32> -> vector<8x128xf32>
    %c0_15 = arith.constant 0 : index
    %c0_16 = arith.constant 0 : index
    %17 = vector.load %arg7[%c0_15, %c0_16] : memref<1x128xf32, #tpu.memory_space<vmem>>, vector<1x128xf32>
    %18 = vector.broadcast %17 : vector<1x128xf32> to vector<8x128xf32>
    %19 = arith.addf %16, %18 : vector<8x128xf32>
    %c0_17 = arith.constant 0 : index
    %c0_18 = arith.constant 0 : index
    %20 = vector.load %arg8[%c0_17, %c0_18] : memref<8x128xf32, #tpu.memory_space<vmem>>, vector<8x128xf32>
    tpu.vector_store %arg8[%c0_17, %c0_18], %19 {strides = array<i32>} : memref<8x128xf32, #tpu.memory_space<vmem>>, vector<8x128xf32>,
    return
  }
  func.func @transform_0(%arg0: i32) -> (i32, i32) {
    %c0_i32 = arith.constant 0 : i32
    %c0_i32_0 = arith.constant 0 : i32
    return %arg0, %c0_i32 : i32, i32
  }
  func.func @transform_1(%arg0: i32) -> (i32, i32) {
    %c0_i32 = arith.constant 0 : i32
    %c0_i32_0 = arith.constant 0 : i32
    %c0_i32_1 = arith.constant 0 : i32
    return %c0_i32, %c0_i32_0 : i32, i32
  }
  func.func @transform_2(%arg0: i32) -> (i32, i32) {
    %c0_i32 = arith.constant 0 : i32
    %c0_i32_0 = arith.constant 0 : i32
    %c0_i32_1 = arith.constant 0 : i32
    return %c0_i32, %c0_i32_0 : i32, i32
  }
  func.func @transform_3(%arg0: i32) -> (i32, i32) {
    %c0_i32 = arith.constant 0 : i32
    %c0_i32_0 = arith.constant 0 : i32
    %c0_i32_1 = arith.constant 0 : i32
    return %c0_i32, %c0_i32_0 : i32, i32
  }
  func.func @transform_4(%arg0: i32) -> (i32, i32) {
    %c0_i32 = arith.constant 0 : i32
    %c0_i32_0 = arith.constant 0 : i32
    %c0_i32_1 = arith.constant 0 : i32
    return %c0_i32, %c0_i32_0 : i32, i32
  }
  func.func @transform_5(%arg0: i32) -> (i32, i32) {
    %c0_i32 = arith.constant 0 : i32
    %c0_i32_0 = arith.constant 0 : i32
    %c0_i32_1 = arith.constant 0 : i32
    return %c0_i32, %c0_i32_0 : i32, i32
  }
  func.func @transform_6(%arg0: i32) -> (i32, i32) {
    %c0_i32 = arith.constant 0 : i32
    %c0_i32_0 = arith.constant 0 : i32
    %c0_i32_1 = arith.constant 0 : i32
    return %c0_i32, %c0_i32_0 : i32, i32
  }
  func.func @transform_7(%arg0: i32) -> (i32, i32) {
    %c0_i32 = arith.constant 0 : i32
    %c0_i32_0 = arith.constant 0 : i32
    return %arg0, %c0_i32 : i32, i32
  }
}

</mosaic_0001>

<bundles_post_ra>
// kernel: tpu_custom_call.1
= control target key start
LH: loop header
LB: loop body
LE: loop exit
PB: predicated region body
PF: predicated region fallthrough
CT: control target
= control target key end

     0   :  { %12 = vsyncpa [#allocation3], 0  ;;  %s711_s0 = inlined_call_operand.hbm [shape: f32[8,8], index: 0, kind: input, shape index: {}]   ;;  %s712_s1 = inlined_call_operand.hbm [shape: f32[8,128], index: 1, kind: input, shape index: {}]   ;;  %s713_s2 = inlined_call_operand.vmem [shape: f32[1,128], index: 2, kind: input, shape index: {}]   ;;  %s714_s3 = inlined_call_operand.hbm [shape: f32[128,128], index: 3, kind: input, shape index: {}]   ;;  %s715_s4 = inlined_call_operand.vmem [shape: f32[1,128], index: 4, kind: input, shape index: {}]   ;;  %s716_s5 = inlined_call_operand.hbm [shape: f32[128,128], index: 5, kind: input, shape index: {}]   ;;  %s717_s6 = inlined_call_operand.vmem [shape: f32[1,128], index: 6, kind: input, shape index: {}]   ;;  %s718_s7 = inlined_call_operand.hbm [shape: f32[8,128], index: 7, kind: output, shape index: {}]  }
   0x1   :  { %13 = vsyncpa [#allocation6], 0 }
   0x2   :  { %14 = vsyncpa [#allocation9], 0 }
   0x3   :  { %15 = vsyncpa [#allocation4], 0  ;;  %s599_s24 = smov [#allocation5]   ;;  %s600_s26 = smov [#allocation2]  }
   0x4   :  { %s32_s25 = sshll.u32 %s599_s24, 4  ;;  %s22_s27 = sshll.u32 %s600_s26, 4  ;;  %s33_s25 = int_to_ptr.vmem [resolvable:$true] %s32_s25  ;;  %s23_s27 = int_to_ptr.vmem [resolvable:$true] %s22_s27 }
   0x5   :  { %s499_s28 = scalar_lea.vmem %s33_s25, 128  ;;  %p504_p1 = scmp.lt.s32.totalorder %s33_s25, %s33_s25 }
   0x6   :  { %p500_p0 = scmp.ne.s32.totalorder %s33_s25, %s499_s28  ;;  %p505_p2 = scmp.lt.s32.totalorder %s499_s28, %s499_s28 }
   0x8   :  { %p506_p3 = por %p505_p2, %p504_p1 }
   0xa   :  { %p507_p4 = pnand %p506_p3, %p500_p0 }
   0xc   :  { %510 = shalt.err (!%p507_p4)
}
   0xd   :  { %35 = dma.hbm_to_vmem [thread:$0]  %s712_s1, 128, %s33_s25, [#allocation6]  }
   0xe   :  { %s519_s8 = scalar_lea.vmem %s23_s27, 128  ;;  %p524_p6 = scmp.lt.s32.totalorder %s23_s27, %s23_s27 }
   0xf   :  { %p520_p5 = scmp.ne.s32.totalorder %s23_s27, %s519_s8  ;;  %p525_p7 = scmp.lt.s32.totalorder %s519_s8, %s519_s8 }
  0x11   :  { %p526_p8 = por %p525_p7, %p524_p6 }
  0x13   :  { %p527_p9 = pnand %p526_p8, %p520_p5 }
  0x15   :  { %530 = shalt.err (!%p527_p9)
}
  0x16   :  { %25 = dma.hbm_to_vmem [thread:$0]  %s711_s0, 128, %s23_s27, [#allocation3]  }
  0x17   :  { %s601_s11 = smov [#allocation7]  }
  0x18   :  { %s43_s12 = sshll.u32 %s601_s11, 4  ;;  %s44_s12 = int_to_ptr.vmem [resolvable:$true] %s43_s12 }
  0x19   :  { %s539_s13 = scalar_lea.vmem %s44_s12, 2048  ;;  %p544_p11 = scmp.lt.s32.totalorder %s44_s12, %s44_s12 }
  0x1a   :  { %p540_p10 = scmp.ne.s32.totalorder %s44_s12, %s539_s13  ;;  %p545_p12 = scmp.lt.s32.totalorder %s539_s13, %s539_s13 }
  0x1c   :  { %p546_p13 = por %p545_p12, %p544_p11 }
  0x1e   :  { %p547_p0 = pnand %p546_p13, %p540_p10 }
  0x20   :  { %550 = shalt.err (!%p547_p0)
}
  0x21   :  { %s602_s1 = smov 128   ;;  %s603_s14 = smov 8  }
  0x22   :  { %49 = dma.hbm_to_vmem [thread:$0]  %s714_s3, 2048, %s44_s12, [#allocation6], %s602_s1, %s602_s1, %s603_s14  }
  0x23   :  { %s604_s17 = smov [#allocation8]  }
  0x24   :  { %s57_s18 = sshll.u32 %s604_s17, 4  ;;  %s58_s18 = int_to_ptr.vmem [resolvable:$true] %s57_s18 }
  0x25   :  { %s559_s0 = scalar_lea.vmem %s58_s18, 2048  ;;  %p564_p2 = scmp.lt.s32.totalorder %s58_s18, %s58_s18 }
  0x26   :  { %p560_p1 = scmp.ne.s32.totalorder %s58_s18, %s559_s0  ;;  %p565_p3 = scmp.lt.s32.totalorder %s559_s0, %s559_s0 }
  0x28   :  { %p566_p4 = por %p565_p3, %p564_p2 }
  0x2a   :  { %p567_p5 = pnand %p566_p4, %p560_p1 }
  0x2c   :  { %570 = shalt.err (!%p567_p5)
}
  0x2d   :  { %63 = dma.hbm_to_vmem [thread:$0]  %s716_s5, 2048, %s58_s18, [#allocation9], %s602_s1, %s602_s1, %s603_s14  }
  0x2e   :  { %591 = dma.done.wait [#allocation3], 128  }
  0x2f   :  { %592 = vsyncadd [#allocation3], 4294967168 }
  0x30   :  { %593 = dma.done.wait [#allocation6], 2176  }
  0x31   :  { %594 = vsyncadd [#allocation6], 4294965120 }
  0x32   :  { %595 = dma.done.wait [#allocation9], 2048  }
  0x33   :  { %596 = vsyncadd [#allocation9], 4294965248  ;;  %v605_v0 = vmov 0.0   ;;  %vm606_vm0 = vmmov 0   ;;  %vm87_vm1 = vcmask 64512   ;;  %v79_v1 = vld [vmem:[#allocation5] sm:$0xff] }
  0x34   :  { %407 = vmatprep.subr.mxu0 %v605_v0  ;;  %409 = vmatprep.mubr.msk.f32.mxu0 %vm606_vm0, %v605_v0  ;;  %v78_v2 = vld [vmem:[#allocation2] sm:$0xff]  ;;  %v177_v3 = vld [vmem:[#allocation7 + $0x78] sm:$0xff]  ;;  %v175_v5 = vld [vmem:[#allocation7 + $0x68] sm:$0xff]  ;;  %s607_s24 = smov [#allocation10]  }
  0x35   :  { %412 = vmatprep.subr.mxu1 %v605_v0  ;;  %444 = vmatprep.mubr.msk.f32.mxu1 %vm606_vm0, %v605_v0  ;;  %v176_v4 = vld [vmem:[#allocation7 + $0x70] sm:$0xff]  ;;  %v174_v6 = vld [vmem:[#allocation7 + $0x60] sm:$0xff]  ;;  %v173_v7 = vld [vmem:[#allocation7 + $0x58] sm:$0xff]  ;;  %s356_s25 = sshll.u32 %s607_s24, 4  ;;  %s357_s25 = int_to_ptr.vmem [resolvable:$true] %s356_s25 }
  0x36   :  { %408 = vmatpush3.msra.mxu0 %v79_v1  ;;  %413 = vmatpush3.msra.mxu1 %v177_v3  ;;  %v172_v8 = vld [vmem:[#allocation7 + $0x50] sm:$0xff]  ;;  %v171_v9 = vld [vmem:[#allocation7 + $0x48] sm:$0xff]  ;;  %v170_v10 = vld [vmem:[#allocation7 + $0x40] sm:$0xff]  ;;  %s571_s26 = scalar_lea.vmem %s357_s25, 128  ;;  %p576_p7 = scmp.lt.s32.totalorder %s357_s25, %s357_s25 }
  0x37   :  { %410 = vmatmul.mubr.msk.f32.vlgmr.msra.gmra.mxu0 %vm87_vm1, %v78_v2  ;;  %414 = vmatprep.subr.mxu1 %v605_v0  ;;  %v169_v11 = vld [vmem:[#allocation7 + $0x38] sm:$0xff]  ;;  %v168_v12 = vld [vmem:[#allocation7 + $0x30] sm:$0xff]  ;;  %v167_v13 = vld [vmem:[#allocation7 + $0x28] sm:$0xff]  ;;  %p572_p6 = scmp.ne.s32.totalorder %s357_s25, %s571_s26  ;;  %p577_p8 = scmp.lt.s32.totalorder %s571_s26, %s571_s26 }
  0x38   :  { %415 = vmatpush3.msra.mxu1 %v176_v4  ;;  %447 = vmatprep.subr.mxu0 %v605_v0  ;;  %v166_v14 = vld [vmem:[#allocation7 + $0x20] sm:$0xff]  ;;  %v165_v15 = vld [vmem:[#allocation7 + $0x18] sm:$0xff]  ;;  %v164_v16 = vld [vmem:[#allocation7 + $0x10] sm:$0xff] }
  0x39   :  { %416 = vmatprep.subr.mxu1 %v605_v0  ;;  %479 = vmatprep.mubr.msk.f32.mxu0 %vm606_vm0, %v605_v0  ;;  %v163_v17 = vld [vmem:[#allocation7 + $0x8] sm:$0xff]  ;;  %v162_v18 = vld [vmem:[#allocation7] sm:$0xff]  ;;  %v271_v19 = vld [vmem:[#allocation8 + $0x78] sm:$0xff]  ;;  %p578_p9 = por %p577_p8, %p576_p7 }
  0x3a   :  { %417 = vmatpush3.msra.mxu1 %v175_v5  ;;  %v270_v20 = vld [vmem:[#allocation8 + $0x70] sm:$0xff]  ;;  %448 = vmatpush3.msra.mxu0 %v271_v19  ;;  %v269_v21 = vld [vmem:[#allocation8 + $0x68] sm:$0xff]  ;;  %v268_v22 = vld [vmem:[#allocation8 + $0x60] sm:$0xff] }
  0x3b   :  { %418 = vmatprep.subr.mxu1 %v605_v0  ;;  %449 = vmatprep.subr.mxu0 %v605_v0  ;;  %v267_v23 = vld [vmem:[#allocation8 + $0x58] sm:$0xff]  ;;  %v266_v24 = vld [vmem:[#allocation8 + $0x50] sm:$0xff]  ;;  %v265_v25 = vld [vmem:[#allocation8 + $0x48] sm:$0xff]  ;;  %p579_p10 = pnand %p578_p9, %p572_p6 }
  0x3c   :  { %419 = vmatpush3.msra.mxu1 %v174_v6  ;;  %450 = vmatpush3.msra.mxu0 %v270_v20  ;;  %v264_v26 = vld [vmem:[#allocation8 + $0x40] sm:$0xff]  ;;  %v263_v27 = vld [vmem:[#allocation8 + $0x38] sm:$0xff]  ;;  %v262_v28 = vld [vmem:[#allocation8 + $0x30] sm:$0xff] }
  0x3d   :  { %420 = vmatprep.subr.mxu1 %v605_v0  ;;  %451 = vmatprep.subr.mxu0 %v605_v0  ;;  %v261_v29 = vld [vmem:[#allocation8 + $0x28] sm:$0xff]  ;;  %v260_v30 = vld [vmem:[#allocation8 + $0x20] sm:$0xff]  ;;  %v259_v31 = vld [vmem:[#allocation8 + $0x18] sm:$0xff] }
  0x3e   :  { %421 = vmatpush3.msra.mxu1 %v173_v7  ;;  %452 = vmatpush3.msra.mxu0 %v269_v21  ;;  %v367_v32 = vld [vmem:[%s713_s2] ss:$0 sm:$0xff]  ;;  %v257_v38 = vld [vmem:[#allocation8 + $0x8] sm:$0xff]  ;;  %v256_v39 = vld [vmem:[#allocation8] sm:$0xff] }
  0x3f   :  { %422 = vmatprep.subr.mxu1 %v605_v0  ;;  %453 = vmatprep.subr.mxu0 %v605_v0  ;;  %v258_v37 = vld [vmem:[#allocation8 + $0x10] sm:$0xff] }
  0x40   :  { %423 = vmatpush3.msra.mxu1 %v172_v8  ;;  %454 = vmatpush3.msra.mxu0 %v268_v22  ;;  %v369_v40 = vld [vmem:[%s715_s4] ss:$0 sm:$0xff] }
  0x41   :  { %424 = vmatprep.subr.mxu1 %v605_v0  ;;  %455 = vmatprep.subr.mxu0 %v605_v0  ;;  %v370_v45 = vld [vmem:[%s717_s6] ss:$0 sm:$0xff] }
  0x42   :  { %425 = vmatpush3.msra.mxu1 %v171_v9  ;;  %456 = vmatpush3.msra.mxu0 %v267_v23 }
  0x43   :  { %426 = vmatprep.subr.mxu1 %v605_v0  ;;  %457 = vmatprep.subr.mxu0 %v605_v0 }
  0x44   :  { %427 = vmatpush3.msra.mxu1 %v170_v10  ;;  %458 = vmatpush3.msra.mxu0 %v266_v24 }
  0x45   :  { %428 = vmatprep.subr.mxu1 %v605_v0  ;;  %459 = vmatprep.subr.mxu0 %v605_v0 }
  0x46   :  { %429 = vmatpush3.msra.mxu1 %v169_v11  ;;  %460 = vmatpush3.msra.mxu0 %v265_v25 }
  0x47   :  { %430 = vmatprep.subr.mxu1 %v605_v0  ;;  %461 = vmatprep.subr.mxu0 %v605_v0 }
  0x48   :  { %431 = vmatpush3.msra.mxu1 %v168_v12  ;;  %462 = vmatpush3.msra.mxu0 %v264_v26 }
  0x49   :  { %432 = vmatprep.subr.mxu1 %v605_v0  ;;  %463 = vmatprep.subr.mxu0 %v605_v0 }
  0x4a   :  { %433 = vmatpush3.msra.mxu1 %v167_v13  ;;  %464 = vmatpush3.msra.mxu0 %v263_v27 }
  0x4b   :  { %434 = vmatprep.subr.mxu1 %v605_v0  ;;  %465 = vmatprep.subr.mxu0 %v605_v0 }
  0x4c   :  { %435 = vmatpush3.msra.mxu1 %v166_v14  ;;  %466 = vmatpush3.msra.mxu0 %v262_v28 }
  0x4d   :  { %436 = vmatprep.subr.mxu1 %v605_v0  ;;  %467 = vmatprep.subr.mxu0 %v605_v0 }
  0x4e   :  { %437 = vmatpush3.msra.mxu1 %v165_v15  ;;  %468 = vmatpush3.msra.mxu0 %v261_v29 }
  0x4f   :  { %438 = vmatprep.subr.mxu1 %v605_v0  ;;  %469 = vmatprep.subr.mxu0 %v605_v0 }
  0x50   :  { %439 = vmatpush3.msra.mxu1 %v164_v16  ;;  %470 = vmatpush3.msra.mxu0 %v260_v30 }
  0x51   :  { %440 = vmatprep.subr.mxu1 %v605_v0  ;;  %471 = vmatprep.subr.mxu0 %v605_v0 }
  0x52   :  { %441 = vmatpush3.msra.mxu1 %v163_v17  ;;  %472 = vmatpush3.msra.mxu0 %v259_v31 }
  0x53   :  { %442 = vmatprep.subr.mxu1 %v605_v0  ;;  %473 = vmatprep.subr.mxu0 %v605_v0 }
  0x54   :  { %443 = vmatpush3.msra.mxu1 %v162_v18  ;;  %474 = vmatpush3.msra.mxu0 %v258_v37 }
  0x55   :  { %475 = vmatprep.subr.mxu0 %v605_v0 }
  0x56   :  { %476 = vmatpush3.msra.mxu0 %v257_v38 }
  0x57   :  { %477 = vmatprep.subr.mxu0 %v605_v0 }
  0x58   :  { %478 = vmatpush3.msra.mxu0 %v256_v39 }
  0xf7   :  { %v157_v33 = vpop.f32.mrf.mxu0 }
  0xf8   :  { %v158_v34 = vadd.f32 %v367_v32, %v157_v33 }
  0xf9   :  { %v411_v35 = vpop.f32.mrf.mxu0 }
  0xfa   :  { %v161_v36 = vmax.f32 %v158_v34, 0.0 }
  0xfc   :  { %445 = vmatmul.mubr.f32.vlgmr.msra.gmra.mxu1 %v161_v36 }
 0x1bc   :  { %v251_v41 = vpop.f32.mrf.mxu1 }
 0x1bd   :  { %v252_v42 = vadd.f32 %v369_v40, %v251_v41 }
 0x1be   :  { %v446_v43 = vpop.f32.mrf.mxu1 }
 0x1bf   :  { %v255_v44 = vmax.f32 %v252_v42, 0.0 }
 0x1c1   :  { %480 = vmatmul.mubr.f32.vlgmr.msra.gmra.mxu0 %v255_v44 }
 0x281   :  { %v345_v46 = vpop.f32.mrf.mxu0 }
 0x282   :  { %v346_v47 = vadd.f32 %v370_v45, %v345_v46 }
 0x283   :  { %v481_v48 = vpop.f32.mrf.mxu0 }
 0x284   :  { %349 = vst [vmem:[#allocation10] sm:$0xff] %v346_v47 }
 0x285   :  { %582 = shalt.err (!%p579_p10)
}
 0x286   :  { %359 = dma.vmem_to_hbm [thread:$0]  %s357_s25, 128, %s718_s7, [#allocation4]  }
 0x287   :  { %597 = dma.done.wait [#allocation4], 128  }
 0x288   :  { %598 = vsyncadd [#allocation4], 4294967168 }
 0x289   :  { %363 = vsyncpa [#allocation3], 1 }
 0x28a   :  { %364 = vsyncpa [#allocation6], 1 }
 0x28b   :  { %365 = vsyncpa [#allocation9], 1 }
 0x28c   :  { %366 = vsyncpa [#allocation4], 1 }

</bundles_post_ra>
